<compile_context>
chip_gen: v6e
topology: v6e:2x2x1
jax: 0.10.0
libtpu: 0.0.40
codegen_flags: <defaults>
</compile_context>

<pallas_src>
import functools
import math

import jax
import jax.numpy as jnp
from jax.experimental import pallas as pl
from jax.experimental.pallas import tpu as pltpu


# ----------------------------------------------------------------------------
# Kernel
# ----------------------------------------------------------------------------
def mlp_kernel(x_ref, w1_ref, b1_ref, w2_ref, b2_ref, o_ref, acc_ref):
    # x_ref : (tm, Cp)  bf16      w1_ref: (Cp, th) bf16    b1_ref: (1, th) f32
    # w2_ref: (th, Cp)  bf16      b2_ref: (1, Cp)  f32
    # o_ref : (tm, Cp)  out dtype acc_ref: (tm, Cp) f32 scratch (resident over k)
    k = pl.program_id(1)

    @pl.when(k == 0)
    def _():
        acc_ref[...] = jnp.zeros_like(acc_ref)

    # c_fc chunk: (tm, Cp) @ (Cp, th) -> f32 accumulate on MXU
    h = jnp.dot(x_ref[...], w1_ref[...], preferred_element_type=jnp.float32)
    h = h + b1_ref[...]

    # exact erf-based GELU (nn.GELU() default), elementwise over the H chunk
    h = 0.5 * h * (1.0 + jax.lax.erf(h * 0.7071067811865476))

    # c_proj chunk: accumulate (tm, th) @ (th, Cp) into the f32 accumulator
    acc_ref[...] += jnp.dot(h.astype(w2_ref.dtype), w2_ref[...],
                            preferred_element_type=jnp.float32)

    @pl.when(k == pl.num_programs(1) - 1)
    def _():
        # b2 added exactly once, in the finalize step.
        o_ref[...] = (acc_ref[...] + b2_ref[...]).astype(o_ref.dtype)

    # TODO(synk): nn.Dropout(p>0) in training mode (stateful PRNG mask) is not
    # implemented; dropout is identity here (eval/inference semantics).


# ----------------------------------------------------------------------------
# Tiling / VMEM budgeting helpers
# ----------------------------------------------------------------------------
def _round_up(a, b):
    return ((a + b - 1) // b) * b


def _vmem_capacity_bytes():
    try:
        return int(pltpu.get_tpu_info().vmem_capacity_bytes)
    except Exception:
        # Conservative fallback (covers v7x, the smallest-VMEM generation).
        return 64 * 1024 * 1024


def _vmem_needed(tm, th, Cp, csz, osz):
    # Double-buffered input/output tiles + f32 accumulator scratch.
    # (1, th)/(1, Cp) bias rows are counted at 8 sublanes (layout padding).
    return (2 * (tm * Cp * csz        # x tile
                 + Cp * th * csz      # W1 H-chunk
                 + 8 * th * 4         # b1 H-chunk (f32)
                 + th * Cp * csz      # W2 H-chunk
                 + 8 * Cp * 4         # b2 (f32)
                 + tm * Cp * osz)     # out tile
            + tm * Cp * 4)            # f32 accumulator (single-buffered scratch)


def _select_tiles(M, Cp, Hp, csz, osz):
    """Pick (tm, th) for this generation's VMEM capacity."""
    cap = _vmem_capacity_bytes()
    budget = int(cap * 0.75)

    # Prefer >= 2 row tiles whenever possible so the "parallel" M axis can be
    # sharded across v7x's 2 TensorCores (single oversized tile serializes).
    Mp0 = _round_up(M, 128)
    tm_cap = Mp0 if Mp0 < 256 else max(128, (Mp0 // 2) // 128 * 128)
    # Bigger VMEM parts (v5e/v6e: 128 MiB) can afford taller row tiles.
    tm_target = 1024 if cap >= 100 * 1024 * 1024 else 512
    tm_candidates = [t for t in (1024, 768, 512, 384, 256, 128)
                     if t <= min(tm_target, tm_cap)]
    if not tm_candidates:
        tm_candidates = [min(tm_target, tm_cap)]

    # th candidates: full-H residency first (weights streamed from HBM exactly
    # once per kernel call), then progressively smaller chunks.
    th_candidates = [Hp] + [t for t in (512, 256, 128) if t < Hp and Hp % t == 0]

    for tm in tm_candidates:
        for th in th_candidates:
            if _vmem_needed(tm, th, Cp, csz, osz) <= budget:
                return tm, th
    # TODO(synk): for extremely wide C on 64 MiB parts, add an output-column
    # grid axis instead of falling back to the minimal tile.
    return 128, min(128, Hp)


# ----------------------------------------------------------------------------
# Parameter prep (called ONCE at init, hoisted out of the forward path)
# ----------------------------------------------------------------------------
def prepare_mlp_params(w1, b1, w2, b2, *, compute_dtype=jnp.bfloat16):
    """w1: (C, H), b1: (H,), w2: (H, C), b2: (C,). Pads + casts once."""
    C, H = w1.shape
    Cp = _round_up(C, 128)
    Hp = _round_up(H, 128)
    w1p = jnp.pad(w1, ((0, Cp - C), (0, Hp - H))).astype(compute_dtype)
    b1p = jnp.pad(b1, (0, Hp - H)).reshape(1, Hp).astype(jnp.float32)
    w2p = jnp.pad(w2, ((0, Hp - H), (0, Cp - C))).astype(compute_dtype)
    b2p = jnp.pad(b2, (0, Cp - C)).reshape(1, Cp).astype(jnp.float32)
    return dict(w1p=w1p, b1p=b1p, w2p=w2p, b2p=b2p,
                C=C, H=H, Cp=Cp, Hp=Hp, compute_dtype=compute_dtype)


# ----------------------------------------------------------------------------
# Forward
# ----------------------------------------------------------------------------
@functools.partial(jax.jit, static_argnames=("tm", "th", "vmem_limit"))
def _mlp_forward_impl(x, w1p, b1p, w2p, b2p, *, tm, th, vmem_limit):
    B, T, C = x.shape
    Cp, Hp = w1p.shape
    M = B * T
    Mp = _round_up(M, tm)
    out_dtype = x.dtype

    x2 = jnp.pad(x.reshape(M, C), ((0, Mp - M), (0, Cp - C))).astype(w1p.dtype)

    grid = (Mp // tm, Hp // th)  # reduction axis (H chunks) innermost

    out2 = pl.pallas_call(
        mlp_kernel,
        out_shape=jax.ShapeDtypeStruct((Mp, Cp), out_dtype),
        grid_spec=pltpu.PrefetchScalarGridSpec(
            num_scalar_prefetch=0,
            grid=grid,
            in_specs=[
                pl.BlockSpec((tm, Cp), lambda i, k: (i, 0)),   # x row tile
                pl.BlockSpec((Cp, th), lambda i, k: (0, k)),   # W1 H-chunk
                pl.BlockSpec((1, th), lambda i, k: (0, k)),    # b1 H-chunk
                pl.BlockSpec((th, Cp), lambda i, k: (k, 0)),   # W2 H-chunk
                pl.BlockSpec((1, Cp), lambda i, k: (0, 0)),    # b2
            ],
            out_specs=pl.BlockSpec((tm, Cp), lambda i, k: (i, 0)),
            scratch_shapes=[pltpu.VMEM((tm, Cp), jnp.float32)],
        ),
        compiler_params=pltpu.CompilerParams(
            dimension_semantics=("parallel", "arbitrary"),
            vmem_limit_bytes=vmem_limit,
        ),
    )(x2, w1p, b1p, w2p, b2p)

    return out2[:M, :C].reshape(B, T, C)


def mlp_forward(x, params, *, tm=None, th=None):
    """x: (B, T, C).  params: output of prepare_mlp_params (padded bf16)."""
    B, T, C = x.shape
    assert C == params["C"], (C, params["C"])
    Cp, Hp = params["Cp"], params["Hp"]
    csz = jnp.dtype(params["compute_dtype"]).itemsize
    osz = jnp.dtype(x.dtype).itemsize

    auto_tm, auto_th = _select_tiles(B * T, Cp, Hp, csz, osz)
    tm = auto_tm if tm is None else tm
    th = auto_th if th is None else th
    assert Hp % th == 0, (Hp, th)

    cap = _vmem_capacity_bytes()
    needed = _vmem_needed(tm, th, Cp, csz, osz)
    vmem_limit = min(max(int(needed * 1.3) + (2 << 20), 16 << 20),
                     int(cap * 0.85))

    return _mlp_forward_impl(x, params["w1p"], params["b1p"], params["w2p"],
                             params["b2p"], tm=tm, th=th,
                             vmem_limit=vmem_limit)


# ----------------------------------------------------------------------------
# Reference (same precision recipe: bf16 operands, f32 accumulation)
# ----------------------------------------------------------------------------
def _ref_mlp(x2, w1, b1, w2, b2, compute_dtype):
    h = jnp.dot(x2.astype(compute_dtype), w1.astype(compute_dtype),
                preferred_element_type=jnp.float32) + b1
    h = jax.nn.gelu(h, approximate=False)
    o = jnp.dot(h.astype(compute_dtype), w2.astype(compute_dtype),
                preferred_element_type=jnp.float32) + b2
    return o


if __name__ == "__main__":
    def run_case(B, T, C, key, tm=None, th=None):
        H = 4 * C
        kx, k1, k2, k3, k4 = jax.random.split(key, 5)
        x = jax.random.normal(kx, (B, T, C), dtype=jnp.float32)
        # PyTorch-Linear-style init, stored transposed as (in, out).
        lim1 = 1.0 / math.sqrt(C)
        lim2 = 1.0 / math.sqrt(H)
        w1 = jax.random.uniform(k1, (C, H), jnp.float32, -lim1, lim1)
        b1 = jax.random.uniform(k2, (H,), jnp.float32, -lim1, lim1)
        w2 = jax.random.uniform(k3, (H, C), jnp.float32, -lim2, lim2)
        b2 = jax.random.uniform(k4, (C,), jnp.float32, -lim2, lim2)

        params = prepare_mlp_params(w1, b1, w2, b2)
        out = jax.block_until_ready(mlp_forward(x, params, tm=tm, th=th))

        ref = _ref_mlp(x.reshape(-1, C), w1, b1, w2, b2,
                       jnp.bfloat16).reshape(B, T, C).astype(x.dtype)
        assert out.shape == (B, T, C)
        err = float(jnp.max(jnp.abs(out - ref)))
        # bf16 matmul operands (f32 accumulation) -> looser tolerance than f32.
        assert jnp.allclose(out, ref, atol=2e-2, rtol=2e-2), err

    key = jax.random.PRNGKey(0)
    k_small, k_big = jax.random.split(key)

    # 1) Module-consistent small config (n_embd=32, batch=2, seq=8),
    #    auto-selected tiles (single grid cell path).
    run_case(2, 8, 32, k_small)

    # 2) Multi-tile path: M=320 (3 row tiles @ tm=128), C=192 -> Cp=256
    #    (padding), H=768 with th=256 -> 3 H-chunks (exercises k>0 accumulation
    #    and the finalize/revisit path).
    run_case(2, 160, 192, k_big, tm=128, th=256)

    print("KERNEL_OK")
</pallas_src>

<mosaic_0001>
module attributes {stable_mosaic.version = 11 : i64} {
  func.func @mlp_kernel(%arg0: i32, %arg1: i32, %arg2: memref<128x128xbf16, #tpu.memory_space<vmem>>, %arg3: memref<128x128xbf16, #tpu.memory_space<vmem>>, %arg4: memref<1x128xf32, #tpu.memory_space<vmem>>, %arg5: memref<128x128xbf16, #tpu.memory_space<vmem>>, %arg6: memref<1x128xf32, #tpu.memory_space<vmem>>, %arg7: memref<128x128xf32, #tpu.memory_space<vmem>>, %arg8: memref<128x128xf32, #tpu.memory_space<vmem>>) attributes {dimension_semantics = [#tpu.dimension_semantics<parallel>, #tpu.dimension_semantics<arbitrary>], iteration_bounds = array<i64: 1, 1>, scalar_prefetch = 0 : i64, scratch_operands = 1 : i64, tpu.core_type = #tpu.core_type<tc>, window_params = [{transform_indices = @transform_0, window_bounds = array<i64: 128, 128>}, {transform_indices = @transform_1, window_bounds = array<i64: 128, 128>}, {transform_indices = @transform_2, window_bounds = array<i64: 1, 128>}, {transform_indices = @transform_3, window_bounds = array<i64: 128, 128>}, {pipeline_mode = #tpu.pipeline_mode<synchronous>, transform_indices = @transform_4, window_bounds = array<i64: 1, 128>}, {transform_indices = @transform_5, window_bounds = array<i64: 128, 128>}]} {
    %c0_i32 = arith.constant 0 : i32
    %0 = arith.cmpi eq, %arg1, %c0_i32 : i32
    %1 = arith.extui %0 : i1 to i32
    %c0_i32_0 = arith.constant 0 : i32
    %2 = arith.cmpi ne, %1, %c0_i32_0 : i32
    scf.if %2 {
      %cst_18 = arith.constant 0.000000e+00 : f32
      %26 = vector.broadcast %cst_18 : f32 to vector<128x128xf32>
      %c0_19 = arith.constant 0 : index
      %c0_20 = arith.constant 0 : index
      %27 = vector.load %arg8[%c0_19, %c0_20] : memref<128x128xf32, #tpu.memory_space<vmem>>, vector<128x128xf32>
      tpu.vector_store %arg8[%c0_19, %c0_20], %26 {strides = array<i32>} : memref<128x128xf32, #tpu.memory_space<vmem>>, vector<128x128xf32>,
    } else {
    }
    %c0 = arith.constant 0 : index
    %c0_1 = arith.constant 0 : index
    %3 = vector.load %arg2[%c0, %c0_1] : memref<128x128xbf16, #tpu.memory_space<vmem>>, vector<128x128xbf16>
    %c0_2 = arith.constant 0 : index
    %c0_3 = arith.constant 0 : index
    %4 = vector.load %arg3[%c0_2, %c0_3] : memref<128x128xbf16, #tpu.memory_space<vmem>>, vector<128x128xbf16>
    %cst = arith.constant dense<0.000000e+00> : vector<128x128xf32>
    %5 = tpu.matmul %3, %4, %cst {dimension_numbers = #tpu.dot_dimension_numbers<[1], [0], [0], [1], [0, 0, 1, 1], [], []>} : vector<128x128xbf16>, vector<128x128xbf16>, vector<128x128xf32> -> vector<128x128xf32>
    %c0_4 = arith.constant 0 : index
    %c0_5 = arith.constant 0 : index
    %6 = vector.load %arg4[%c0_4, %c0_5] : memref<1x128xf32, #tpu.memory_space<vmem>>, vector<1x128xf32>
    %7 = vector.broadcast %6 : vector<1x128xf32> to vector<128x128xf32>
    %8 = arith.addf %5, %7 : vector<128x128xf32>
    %cst_6 = arith.constant 5.000000e-01 : f32
    %9 = vector.broadcast %cst_6 : f32 to vector<128x128xf32>
    %10 = arith.mulf %9, %8 : vector<128x128xf32>
    %cst_7 = arith.constant 0.707106769 : f32
    %11 = vector.broadcast %cst_7 : f32 to vector<128x128xf32>
    %12 = arith.mulf %8, %11 : vector<128x128xf32>
    %13 = math.erf %12 : vector<128x128xf32>
    %cst_8 = arith.constant 1.000000e+00 : f32
    %14 = vector.broadcast %cst_8 : f32 to vector<128x128xf32>
    %15 = arith.addf %14, %13 : vector<128x128xf32>
    %16 = arith.mulf %10, %15 : vector<128x128xf32>
    %c0_9 = arith.constant 0 : index
    %c0_10 = arith.constant 0 : index
    %17 = vector.load %arg8[%c0_9, %c0_10] : memref<128x128xf32, #tpu.memory_space<vmem>>, vector<128x128xf32>
    %18 = arith.truncf %16 : vector<128x128xf32> to vector<128x128xbf16>
    %c0_11 = arith.constant 0 : index
    %c0_12 = arith.constant 0 : index
    %19 = vector.load %arg5[%c0_11, %c0_12] : memref<128x128xbf16, #tpu.memory_space<vmem>>, vector<128x128xbf16>
    %cst_13 = arith.constant dense<0.000000e+00> : vector<128x128xf32>
    %20 = tpu.matmul %18, %19, %cst_13 {dimension_numbers = #tpu.dot_dimension_numbers<[1], [0], [0], [1], [0, 0, 1, 1], [], []>} : vector<128x128xbf16>, vector<128x128xbf16>, vector<128x128xf32> -> vector<128x128xf32>
    %21 = arith.addf %17, %20 : vector<128x128xf32>
    %c0_14 = arith.constant 0 : index
    %c0_15 = arith.constant 0 : index
    %22 = vector.load %arg8[%c0_14, %c0_15] : memref<128x128xf32, #tpu.memory_space<vmem>>, vector<128x128xf32>
    tpu.vector_store %arg8[%c0_14, %c0_15], %21 {strides = array<i32>} : memref<128x128xf32, #tpu.memory_space<vmem>>, vector<128x128xf32>,
    %c0_i32_16 = arith.constant 0 : i32
    %23 = arith.cmpi eq, %arg1, %c0_i32_16 : i32
    %24 = arith.extui %23 : i1 to i32
    %c0_i32_17 = arith.constant 0 : i32
    %25 = arith.cmpi ne, %24, %c0_i32_17 : i32
    scf.if %25 {
      %c0_18 = arith.constant 0 : index
      %c0_19 = arith.constant 0 : index
      %26 = vector.load %arg8[%c0_18, %c0_19] : memref<128x128xf32, #tpu.memory_space<vmem>>, vector<128x128xf32>
      %c0_20 = arith.constant 0 : index
      %c0_21 = arith.constant 0 : index
      %27 = vector.load %arg6[%c0_20, %c0_21] : memref<1x128xf32, #tpu.memory_space<vmem>>, vector<1x128xf32>
      %28 = vector.broadcast %27 : vector<1x128xf32> to vector<128x128xf32>
      %29 = arith.addf %26, %28 : vector<128x128xf32>
      %c0_22 = arith.constant 0 : index
      %c0_23 = arith.constant 0 : index
      %30 = vector.load %arg7[%c0_22, %c0_23] : memref<128x128xf32, #tpu.memory_space<vmem>>, vector<128x128xf32>
      tpu.vector_store %arg7[%c0_22, %c0_23], %29 {strides = array<i32>} : memref<128x128xf32, #tpu.memory_space<vmem>>, vector<128x128xf32>,
    } else {
    }
    return
  }
  func.func @transform_0(%arg0: i32, %arg1: i32) -> (i32, i32) {
    %c0_i32 = arith.constant 0 : i32
    %c0_i32_0 = arith.constant 0 : i32
    return %arg0, %c0_i32 : i32, i32
  }
  func.func @transform_1(%arg0: i32, %arg1: i32) -> (i32, i32) {
    %c0_i32 = arith.constant 0 : i32
    %c0_i32_0 = arith.constant 0 : i32
    return %c0_i32, %arg1 : i32, i32
  }
  func.func @transform_2(%arg0: i32, %arg1: i32) -> (i32, i32) {
    %c0_i32 = arith.constant 0 : i32
    %c0_i32_0 = arith.constant 0 : i32
    return %c0_i32, %arg1 : i32, i32
  }
  func.func @transform_3(%arg0: i32, %arg1: i32) -> (i32, i32) {
    %c0_i32 = arith.constant 0 : i32
    %c0_i32_0 = arith.constant 0 : i32
    return %arg1, %c0_i32 : i32, i32
  }
  func.func @transform_4(%arg0: i32, %arg1: i32) -> (i32, i32) {
    %c0_i32 = arith.constant 0 : i32
    %c0_i32_0 = arith.constant 0 : i32
    %c0_i32_1 = arith.constant 0 : i32
    return %c0_i32, %c0_i32_0 : i32, i32
  }
  func.func @transform_5(%arg0: i32, %arg1: i32) -> (i32, i32) {
    %c0_i32 = arith.constant 0 : i32
    %c0_i32_0 = arith.constant 0 : i32
    return %arg0, %c0_i32 : i32, i32
  }
}

</mosaic_0001>

<bundles_post_ra>
// kernel: _mlp_forward_impl.1
= control target key start
LH: loop header
LB: loop body
LE: loop exit
PB: predicated region body
PF: predicated region fallthrough
CT: control target
= control target key end

     0   :  { %10 = vsyncpa [#allocation4], 0  ;;  %s850_s18 = smov [#allocation3]   ;;  %s1038_s0 = inlined_call_operand.vmem [shape: bf16[128,128], index: 0, kind: input, shape index: {}]   ;;  %s1039_s1 = inlined_call_operand.vmem [shape: bf16[128,128], index: 1, kind: input, shape index: {}]   ;;  %s1040_s2 = inlined_call_operand.vmem [shape: f32[1,128], index: 2, kind: input, shape index: {}]   ;;  %s1041_s3 = inlined_call_operand.hbm [shape: bf16[128,128], index: 3, kind: input, shape index: {}]   ;;  %s1042_s4 = inlined_call_operand.vmem [shape: f32[1,128], index: 4, kind: input, shape index: {}]   ;;  %s1043_s5 = inlined_call_operand.vmem [shape: f32[128,128], index: 5, kind: output, shape index: {}]  }
   0x1   :  { %s22_s19 = sshll.u32 %s850_s18, 4  ;;  %s23_s19 = int_to_ptr.vmem [resolvable:$true] %s22_s19 }
   0x2   :  { %s836_s20 = scalar_lea.vmem %s23_s19, 1024  ;;  %p841_p1 = scmp.lt.s32.totalorder %s23_s19, %s23_s19 }
   0x3   :  { %p837_p0 = scmp.ne.s32.totalorder %s23_s19, %s836_s20  ;;  %p842_p2 = scmp.lt.s32.totalorder %s836_s20, %s836_s20 }
   0x5   :  { %p843_p3 = por %p842_p2, %p841_p1 }
   0x7   :  { %p844_p4 = pnand %p843_p3, %p837_p0 }
   0x9   :  { %847 = shalt.err (!%p844_p4)
}
   0xa   :  { %s851_s21 = smov 64   ;;  %s852_s22 = smov 4  }
   0xb   :  { %28 = dma.hbm_to_vmem [thread:$0]  %s1041_s3, 1024, %s23_s19, [#allocation4], %s851_s21, %s851_s21, %s852_s22  }
   0xc   :  { %848 = dma.done.wait [#allocation4], 1024  }
   0xd   :  { %849 = vsyncadd [#allocation4], 4294966272  ;;  %v772_v0 = vld [vmem:[%s1039_s1 + $0x38] sm:$0xff]   ;;  %v773_v1 = vld [vmem:[%s1039_s1 + $0x30] sm:$0xff]  }
   0xe   :  { %705 = vmatprep.subr.bf16.mxu0 %v772_v0  ;;  %v774_v2 = vld [vmem:[%s1039_s1 + $0x28] sm:$0xff]   ;;  %v775_v3 = vld [vmem:[%s1039_s1 + $0x20] sm:$0xff]   ;;  %v776_v5 = vld [vmem:[%s1039_s1 + $0x18] sm:$0xff]  }
   0xf   :  { %706 = vmatpush3.bf16.msra.mxu0 %v772_v0  ;;  %v780_v4 = vld [vmem:[%s1038_s0] sm:$0xff]   ;;  %v777_v6 = vld [vmem:[%s1039_s1 + $0x10] sm:$0xff]   ;;  %v778_v7 = vld [vmem:[%s1039_s1 + $0x8] sm:$0xff]  }
  0x10   :  { %707 = vmatprep.subr.bf16.mxu0 %v773_v1  ;;  %721 = vmatprep.mubr.bf16.mxu0 %v780_v4  ;;  %v779_v8 = vld [vmem:[%s1039_s1] sm:$0xff]   ;;  %v781_v9 = vld [vmem:[%s1038_s0 + $0x8] sm:$0xff]   ;;  %v782_v10 = vld [vmem:[%s1038_s0 + $0x10] sm:$0xff]  }
  0x11   :  { %v783_v11 = vld [vmem:[%s1038_s0 + $0x18] sm:$0xff]   ;;  %v784_v12 = vld [vmem:[%s1038_s0 + $0x20] sm:$0xff]   ;;  %v785_v13 = vld [vmem:[%s1038_s0 + $0x28] sm:$0xff]  }
  0x12   :  { %v786_v14 = vld [vmem:[%s1038_s0 + $0x30] sm:$0xff]   ;;  %v787_v15 = vld [vmem:[%s1038_s0 + $0x38] sm:$0xff]   ;;  %v790_v18 = vld [vmem:[#allocation3 + $0x28] sm:$0xff]  }
  0x13   :  { %708 = vmatpush3.bf16.msra.mxu0 %v773_v1  ;;  %v788_v16 = vld [vmem:[#allocation3 + $0x38] sm:$0xff]   ;;  %v789_v17 = vld [vmem:[#allocation3 + $0x30] sm:$0xff]   ;;  %v791_v19 = vld [vmem:[#allocation3 + $0x20] sm:$0xff]  }
  0x14   :  { %709 = vmatprep.subr.bf16.mxu0 %v774_v2  ;;  %737 = vmatprep.subr.bf16.mxu1 %v788_v16  ;;  %v792_v20 = vld [vmem:[#allocation3 + $0x18] sm:$0xff]   ;;  %v793_v21 = vld [vmem:[#allocation3 + $0x10] sm:$0xff]   ;;  %v794_v22 = vld [vmem:[#allocation3 + $0x8] sm:$0xff]  }
  0x15   :  { %738 = vmatpush3.bf16.msra.mxu1 %v788_v16  ;;  %v795_v23 = vld [vmem:[#allocation3] sm:$0xff]  }
  0x16   :  { %739 = vmatprep.subr.bf16.mxu1 %v789_v17  ;;  %v937_v24 = vld [vmem:[%s1040_s2] ss:$0 sm:$0xff] }
  0x17   :  { %710 = vmatpush3.bf16.msra.mxu0 %v774_v2 }
  0x18   :  { %711 = vmatprep.subr.bf16.mxu0 %v775_v3 }
  0x19   :  { %740 = vmatpush3.bf16.msra.mxu1 %v789_v17 }
  0x1a   :  { %741 = vmatprep.subr.bf16.mxu1 %v790_v18 }
  0x1b   :  { %712 = vmatpush3.bf16.msra.mxu0 %v775_v3 }
  0x1c   :  { %713 = vmatprep.subr.bf16.mxu0 %v776_v5 }
  0x1d   :  { %742 = vmatpush3.bf16.msra.mxu1 %v790_v18 }
  0x1e   :  { %743 = vmatprep.subr.bf16.mxu1 %v791_v19 }
  0x1f   :  { %714 = vmatpush3.bf16.msra.mxu0 %v776_v5 }
  0x20   :  { %715 = vmatprep.subr.bf16.mxu0 %v777_v6 }
  0x21   :  { %744 = vmatpush3.bf16.msra.mxu1 %v791_v19 }
  0x22   :  { %745 = vmatprep.subr.bf16.mxu1 %v792_v20 }
  0x23   :  { %716 = vmatpush3.bf16.msra.mxu0 %v777_v6 }
  0x24   :  { %717 = vmatprep.subr.bf16.mxu0 %v778_v7 }
  0x25   :  { %746 = vmatpush3.bf16.msra.mxu1 %v792_v20 }
  0x26   :  { %747 = vmatprep.subr.bf16.mxu1 %v793_v21 }
  0x27   :  { %718 = vmatpush3.bf16.msra.mxu0 %v778_v7 }
  0x28   :  { %719 = vmatprep.subr.bf16.mxu0 %v779_v8 }
  0x29   :  { %748 = vmatpush3.bf16.msra.mxu1 %v793_v21 }
  0x2a   :  { %749 = vmatprep.subr.bf16.mxu1 %v794_v22 }
  0x2b   :  { %720 = vmatpush3.bf16.msra.mxu0 %v779_v8 }
  0x2d   :  { %750 = vmatpush3.bf16.msra.mxu1 %v794_v22 }
  0x2e   :  { %722 = vmatmul.mubr.bf16.vlgmr.msra.gmra.mxu0 %v781_v9  ;;  %751 = vmatprep.subr.bf16.mxu1 %v795_v23 }
  0x2f   :  { %725 = vmatprep.mubr.bf16.mxu0 %v782_v10 }
  0x31   :  { %752 = vmatpush3.bf16.msra.mxu1 %v795_v23 }
  0x36   :  { %726 = vmatmul.mubr.bf16.gmra.mxu0 %v783_v11 }
  0x37   :  { %729 = vmatprep.mubr.bf16.mxu0 %v784_v12 }
  0x3e   :  { %730 = vmatmul.mubr.bf16.gmra.mxu0 %v785_v13 }
  0x3f   :  { %733 = vmatprep.mubr.bf16.mxu0 %v786_v14 }
  0x46   :  { %734 = vmatmul.mubr.bf16.gmra.mxu0 %v787_v15 }
  0xee   :  { %v723_v25 = vpop.f32.mrf.mxu0 }
  0xef   :  { %v233_v26 = vadd.f32 %v723_v25, %v937_v24 }
  0xf0   :  { %v224_v27 = vpop.f32.mrf.mxu0 }
  0xf1   :  { %v305_v28 = vmul.f32 0.70710677, %v233_v26  ;;  %v225_v29 = vadd.f32 %v937_v24, %v224_v27  ;;  %v289_v5 = vmul.f32 0.5, %v233_v26 }
  0xf2   :  { %v724_v30 = vpop.f32.mrf.mxu0 }
  0xf3   :  { %v303_v31 = vmul.f32 0.70710677, %v225_v29  ;;  %v236_v32 = vadd.f32 %v724_v30, %v937_v24  ;;  %796 = verf.f32 %v305_v28  ;;  %v287_v6 = vmul.f32 0.5, %v225_v29 }
  0xf4   :  { %v227_v33 = vpop.f32.mrf.mxu0 }
  0xf5   :  { %v306_v34 = vmul.f32 0.70710677, %v236_v32  ;;  %v228_v35 = vadd.f32 %v937_v24, %v227_v33  ;;  %798 = verf.f32 %v303_v31  ;;  %v290_v2 = vmul.f32 0.5, %v236_v32 }
  0xf6   :  { %v727_v36 = vpop.f32.mrf.mxu0 }
  0xf7   :  { %800 = verf.f32 %v306_v34  ;;  %v304_v37 = vmul.f32 0.70710677, %v228_v35  ;;  %v944_v38 = vadd.f32 %v727_v36, %v937_v24  ;;  %v288_v9 = vmul.f32 0.5, %v228_v35 }
  0xf8   :  { %v240_v39 = vpop.f32.mrf.mxu0 }
  0xf9   :  { %802 = verf.f32 %v304_v37  ;;  %v947_v40 = vadd.f32 %v937_v24, %v240_v39  ;;  %v309_v41 = vmul.f32 0.70710677, %v944_v38 }
  0xfa   :  { %v728_v42 = vpop.f32.mrf.mxu0 }
  0xfb   :  { %v307_v43 = vmul.f32 0.70710677, %v947_v40  ;;  %v252_v44 = vadd.f32 %v728_v42, %v937_v24  ;;  %v291_v32 = vmul.f32 0.5, %v947_v40 }
  0xfc   :  { %v243_v45 = vpop.f32.mrf.mxu0 }
  0xfd   :  { %804 = verf.f32 %v307_v43  ;;  %v310_v46 = vmul.f32 0.70710677, %v252_v44  ;;  %v244_v47 = vadd.f32 %v937_v24, %v243_v45  ;;  %v294_v33 = vmul.f32 0.5, %v252_v44 }
  0xfe   :  { %806 = verf.f32 %v309_v41  ;;  %v731_v48 = vpop.f32.mrf.mxu0  ;;  %v293_v41 = vmul.f32 0.5, %v944_v38 }
  0xff   :  { %808 = verf.f32 %v310_v46  ;;  %v308_v49 = vmul.f32 0.70710677, %v244_v47  ;;  %v954_v50 = vadd.f32 %v731_v48, %v937_v24  ;;  %v292_v34 = vmul.f32 0.5, %v244_v47 }
 0x100   :  { %v256_v51 = vpop.f32.mrf.mxu0  ;;  %v797_v53 = vpop.eup %796 }
 0x101   :  { %810 = verf.f32 %v308_v49  ;;  %v313_v52 = vmul.f32 0.70710677, %v954_v50  ;;  %v958_v54 = vadd.f32 %v937_v24, %v256_v51  ;;  %v337_v1 = vadd.f32 1.0, %v797_v53 }
 0x102   :  { %v732_v55 = vpop.f32.mrf.mxu0  ;;  %v799_v56 = vpop.eup %798 }
 0x103   :  { %v961_v57 = vadd.f32 %v732_v55, %v937_v24  ;;  %v311_v59 = vmul.f32 0.70710677, %v958_v54  ;;  %812 = verf.f32 %v313_v52  ;;  %v335_v4 = vadd.f32 1.0, %v799_v56 }
 0x104   :  { %v801_v58 = vpop.eup %800  ;;  %v259_v60 = vpop.f32.mrf.mxu0  ;;  %v353_v15 = vmul.f32 %v337_v1, %v289_v5  ;;  %v295_v53 = vmul.f32 0.5, %v958_v54 }
 0x105   :  { %v338_v61 = vadd.f32 1.0, %v801_v58  ;;  %v314_v62 = vmul.f32 0.70710677, %v961_v57  ;;  %v966_v63 = vadd.f32 %v937_v24, %v259_v60  ;;  %814 = verf.f32 %v311_v59 }
 0x106   :  { %v803_v0 = vpop.eup %802  ;;  %v735_v3 = vpop.f32.mrf.mxu0  ;;  %v351_v17 = vmul.f32 %v335_v4, %v287_v6  ;;  %v298_v38 = vmul.f32 0.5, %v961_v57  ;;  %v297_v59 = vmul.f32 0.5, %v954_v50 }
 0x107   :  { %816 = verf.f32 %v314_v62  ;;  %v312_v7 = vmul.f32 0.70710677, %v966_v63  ;;  %v354_v8 = vmul.f32 %v338_v61, %v290_v2  ;;  %v970_v10 = vadd.f32 %v735_v3, %v937_v24 }
 0x108   :  { %v272_v11 = vpop.f32.mrf.mxu0  ;;  %v336_v12 = vadd.f32 1.0, %v803_v0  ;;  %v296_v56 = vmul.f32 0.5, %v966_v63 }
 0x109   :  { %818 = verf.f32 %v312_v7  ;;  %v973_v13 = vadd.f32 %v937_v24, %v272_v11  ;;  %v317_v20 = vmul.f32 0.70710677, %v970_v10  ;;  %v384_v27 = vpack.c.bf16 %v354_v8, %v353_v15 }
 0x10a   :  { %v805_v14 = vpop.eup %804  ;;  %v736_v16 = vpop.f32.mrf.mxu0  ;;  %v352_v18 = vmul.f32 %v336_v12, %v288_v9  ;;  %v301_v50 = vmul.f32 0.5, %v970_v10 }
 0x10b   :  { %v807_v19 = vpop.eup %806  ;;  %v315_v21 = vmul.f32 0.70710677, %v973_v13  ;;  %v284_v23 = vadd.f32 %v736_v16, %v937_v24  ;;  %v339_v28 = vadd.f32 1.0, %v805_v14  ;;  %v299_v57 = vmul.f32 0.5, %v973_v13  ;;  %v672_v13 = vld [vmem:[%s1042_s4] ss:$0 sm:$0xff] }
 0x10c   :  { %v809_v22 = vpop.eup %808  ;;  %v275_v25 = vpop.f32.mrf.mxu0  ;;  %v383_v26 = vpack.c.bf16 %v352_v18, %v351_v17  ;;  %v341_v36 = vadd.f32 1.0, %v807_v19 }
 0x10d   :  { %v342_v29 = vadd.f32 1.0, %v809_v22  ;;  %820 = verf.f32 %v315_v21  ;;  %v276_v30 = vadd.f32 %v937_v24, %v275_v25  ;;  %v318_v35 = vmul.f32 0.70710677, %v284_v23 }
 0x10e   :  { %v811_v31 = vpop.eup %810  ;;  %753 = vmatprep.mubr.bf16.mxu1 %v383_v26  ;;  %822 = verf.f32 %v317_v20  ;;  %v355_v42 = vmul.f32 %v339_v28, %v291_v32  ;;  %v357_v48 = vmul.f32 %v341_v36, %v293_v41  ;;  %v302_v8 = vmul.f32 0.5, %v284_v23 }
 0x10f   :  { %v340_v37 = vadd.f32 1.0, %v811_v31  ;;  %v316_v39 = vmul.f32 0.70710677, %v276_v30  ;;  %754 = vmatmul.mubr.bf16.vlgmr.msra.gmra.mxu1 %v384_v27  ;;  %824 = verf.f32 %v318_v35  ;;  %v358_v43 = vmul.f32 %v342_v29, %v294_v33 }
 0x110   :  { %v813_v24 = vpop.eup %812  ;;  %v300_v9 = vmul.f32 0.5, %v276_v30 }
 0x111   :  { %v356_v45 = vmul.f32 %v340_v37, %v292_v34  ;;  %826 = verf.f32 %v316_v39  ;;  %v386_v51 = vpack.c.bf16 %v358_v43, %v357_v48  ;;  %v345_v55 = vadd.f32 1.0, %v813_v24 }
 0x112   :  { %v815_v46 = vpop.eup %814 }
 0x113   :  { %v385_v40 = vpack.c.bf16 %v356_v45, %v355_v42  ;;  %v343_v47 = vadd.f32 1.0, %v815_v46  ;;  %v361_v1 = vmul.f32 %v345_v55, %v297_v59 }
 0x114   :  { %v817_v44 = vpop.eup %816 }
 0x115   :  { %v346_v49 = vadd.f32 1.0, %v817_v44  ;;  %757 = vmatprep.mubr.bf16.mxu1 %v385_v40  ;;  %v359_v60 = vmul.f32 %v343_v47, %v295_v53 }
 0x116   :  { %v819_v52 = vpop.eup %818 }
 0x117   :  { %v344_v58 = vadd.f32 1.0, %v819_v52  ;;  %758 = vmatmul.mubr.bf16.gmra.mxu1 %v386_v51  ;;  %v362_v61 = vmul.f32 %v346_v49, %v298_v38 }
 0x119   :  { %v360_v62 = vmul.f32 %v344_v58, %v296_v56  ;;  %v388_v54 = vpack.c.bf16 %v362_v61, %v361_v1 }
 0x11a   :  { %v821_v0 = vpop.eup %820 }
 0x11b   :  { %v387_v2 = vpack.c.bf16 %v360_v62, %v359_v60  ;;  %v823_v3 = vpop.eup %822  ;;  %v347_v5 = vadd.f32 1.0, %v821_v0 }
 0x11c   :  { %v825_v4 = vpop.eup %824  ;;  %v349_v63 = vadd.f32 1.0, %v823_v3 }
 0x11d   :  { %761 = vmatprep.mubr.bf16.mxu1 %v387_v2  ;;  %v350_v7 = vadd.f32 1.0, %v825_v4  ;;  %v363_v12 = vmul.f32 %v347_v5, %v299_v57 }
 0x11e   :  { %v827_v6 = vpop.eup %826  ;;  %v365_v16 = vmul.f32 %v349_v63, %v301_v50 }
 0x11f   :  { %v348_v11 = vadd.f32 1.0, %v827_v6  ;;  %762 = vmatmul.mubr.bf16.gmra.mxu1 %v388_v54  ;;  %v366_v14 = vmul.f32 %v350_v7, %v302_v8 }
 0x121   :  { %v364_v15 = vmul.f32 %v348_v11, %v300_v9  ;;  %v390_v18 = vpack.c.bf16 %v366_v14, %v365_v16 }
 0x123   :  { %v389_v17 = vpack.c.bf16 %v364_v15, %v363_v12 }
 0x125   :  { %765 = vmatprep.mubr.bf16.mxu1 %v389_v17 }
 0x127   :  { %766 = vmatmul.mubr.bf16.gmra.mxu1 %v390_v18 }
 0x1cf   :  { %v755_v19 = vpop.f32.mrf.mxu1 }
 0x1d0   :  { %v612_v20 = vadd.f32 %v755_v19, %v672_v13 }
 0x1d1   :  { %v489_v21 = vpop.f32.mrf.mxu1 }
 0x1d2   :  { %628 = vst [vmem:[%s1043_s5 + $0x10] sm:$0xff] %v612_v20  ;;  %v610_v10 = vadd.f32 %v672_v13, %v489_v21 }
 0x1d3   :  { %v756_v22 = vpop.f32.mrf.mxu1 }
 0x1d4   :  { %626 = vst [vmem:[%s1043_s5] sm:$0xff] %v610_v10  ;;  %v613_v23 = vadd.f32 %v756_v22, %v672_v13 }
 0x1d5   :  { %v492_v25 = vpop.f32.mrf.mxu1 }
 0x1d6   :  { %629 = vst [vmem:[%s1043_s5 + $0x18] sm:$0xff] %v613_v23  ;;  %v611_v26 = vadd.f32 %v672_v13, %v492_v25 }
 0x1d7   :  { %v759_v27 = vpop.f32.mrf.mxu1 }
 0x1d8   :  { %627 = vst [vmem:[%s1043_s5 + $0x8] sm:$0xff] %v611_v26  ;;  %v616_v28 = vadd.f32 %v759_v27, %v672_v13 }
 0x1d9   :  { %v505_v29 = vpop.f32.mrf.mxu1 }
 0x1da   :  { %632 = vst [vmem:[%s1043_s5 + $0x30] sm:$0xff] %v616_v28  ;;  %v614_v30 = vadd.f32 %v672_v13, %v505_v29 }
 0x1db   :  { %v760_v31 = vpop.f32.mrf.mxu1 }
 0x1dc   :  { %630 = vst [vmem:[%s1043_s5 + $0x20] sm:$0xff] %v614_v30  ;;  %v617_v32 = vadd.f32 %v760_v31, %v672_v13 }
 0x1dd   :  { %v508_v33 = vpop.f32.mrf.mxu1 }
 0x1de   :  { %633 = vst [vmem:[%s1043_s5 + $0x38] sm:$0xff] %v617_v32  ;;  %v615_v34 = vadd.f32 %v672_v13, %v508_v33 }
 0x1df   :  { %v763_v35 = vpop.f32.mrf.mxu1 }
 0x1e0   :  { %631 = vst [vmem:[%s1043_s5 + $0x28] sm:$0xff] %v615_v34  ;;  %v620_v36 = vadd.f32 %v763_v35, %v672_v13 }
 0x1e1   :  { %v521_v37 = vpop.f32.mrf.mxu1 }
 0x1e2   :  { %636 = vst [vmem:[%s1043_s5 + $0x50] sm:$0xff] %v620_v36  ;;  %v618_v39 = vadd.f32 %v672_v13, %v521_v37 }
 0x1e3   :  { %v764_v41 = vpop.f32.mrf.mxu1 }
 0x1e4   :  { %634 = vst [vmem:[%s1043_s5 + $0x40] sm:$0xff] %v618_v39  ;;  %v621_v42 = vadd.f32 %v764_v41, %v672_v13 }
 0x1e5   :  { %v524_v43 = vpop.f32.mrf.mxu1 }
 0x1e6   :  { %637 = vst [vmem:[%s1043_s5 + $0x58] sm:$0xff] %v621_v42  ;;  %v619_v45 = vadd.f32 %v672_v13, %v524_v43 }
 0x1e7   :  { %v767_v24 = vpop.f32.mrf.mxu1 }
 0x1e8   :  { %635 = vst [vmem:[%s1043_s5 + $0x48] sm:$0xff] %v619_v45  ;;  %v624_v46 = vadd.f32 %v767_v24, %v672_v13 }
 0x1e9   :  { %v537_v48 = vpop.f32.mrf.mxu1 }
 0x1ea   :  { %640 = vst [vmem:[%s1043_s5 + $0x70] sm:$0xff] %v624_v46  ;;  %v622_v40 = vadd.f32 %v672_v13, %v537_v48 }
 0x1eb   :  { %v768_v44 = vpop.f32.mrf.mxu1 }
 0x1ec   :  { %638 = vst [vmem:[%s1043_s5 + $0x60] sm:$0xff] %v622_v40  ;;  %v625_v47 = vadd.f32 %v768_v44, %v672_v13 }
 0x1ed   :  { %v540_v49 = vpop.f32.mrf.mxu1 }
 0x1ee   :  { %641 = vst [vmem:[%s1043_s5 + $0x78] sm:$0xff] %v625_v47  ;;  %v623_v51 = vadd.f32 %v672_v13, %v540_v49 }
 0x1f0   :  { %639 = vst [vmem:[%s1043_s5 + $0x68] sm:$0xff] %v623_v51 }
 0x1f1   :  { %646 = vsyncpa [#allocation4], 1 }

</bundles_post_ra>
